<compile_context>
chip_gen: v7x
topology: tpu7x:2x2x1
jax: 0.10.0
libtpu: 0.0.40
codegen_flags: <defaults>
</compile_context>

<pallas_src>
import functools

import jax
import jax.numpy as jnp
from jax.experimental import pallas as pl
from jax.experimental.pallas import tpu as pltpu


def _round_up(x, m):
    return ((x + m - 1) // m) * m


def _sampling_kernel(h_ref, w_ref, b_ref, eps_ref, z_ref, kl_ref,
                     *, sample_rate, batch_size, block_b, d_pad):
    tile = pl.program_id(0)

    h = h_ref[...]  # (TB, D_in), already f32

    # Fused heads: one matmul, one broadcasted bias add.
    acc = jnp.dot(h, w_ref[...], preferred_element_type=jnp.float32) + b_ref[...]

    # Split at a 128-lane-aligned boundary (d_pad is a multiple of 128).
    z_mean = acc[:, :d_pad]
    z_log_var = -jnp.abs(acc[:, d_pad:])

    # Single transcendental: exp(z_log_var) == e * e.
    e = jnp.exp(0.5 * z_log_var)

    # Mask out batch-padding rows from the KL sum (padded columns already
    # contribute exactly zero: 1 + 0 - 0 - exp(0) = 0).
    row = tile * block_b + jax.lax.broadcasted_iota(jnp.int32, (block_b, d_pad), 0)
    valid = row < batch_size
    kl_terms = jnp.where(valid, 1.0 + z_log_var - z_mean * z_mean - e * e, 0.0)

    # Per-tile partial KL (scalar) straight to SMEM; reduced in the wrapper.
    kl_ref[0, 0] = -0.5 * jnp.sum(kl_terms)

    # Reparameterization: z = mean + exp(logvar/2) * eps * sample_rate
    z_ref[...] = (
        z_mean + e * eps_ref[...] * jnp.float32(sample_rate)
    ).astype(z_ref.dtype)


def sampling_forward(h, w_mean, b_mean, w_var, b_var, eps,
                     sample_rate=1.0, block_b=256):
    """Sampling module forward pass as a single batch-tiled Pallas kernel.

    h:       (B, D_in)     float32
    w_mean:  (D_in, D_out) float32   (pre-transposed nn.Linear weight)
    b_mean:  (1, D_out)    float32
    w_var:   (D_in, D_out) float32
    b_var:   (1, D_out)    float32
    eps:     (B, D_out)    float32 standard-normal noise
    returns: (z_vecs (B, D_out), kl_loss scalar)
    """
    B, D_in = h.shape
    D_out = w_mean.shape[1]
    D_pad = _round_up(D_out, 128)          # lane-dense per-head width

    # Fused + zero-padded weights / biases: [mean head | var head].
    w_fused = jnp.zeros((D_in, 2 * D_pad), jnp.float32)
    w_fused = w_fused.at[:, :D_out].set(w_mean.astype(jnp.float32))
    w_fused = w_fused.at[:, D_pad:D_pad + D_out].set(w_var.astype(jnp.float32))
    b_fused = jnp.zeros((1, 2 * D_pad), jnp.float32)
    b_fused = b_fused.at[:, :D_out].set(b_mean.reshape(1, D_out).astype(jnp.float32))
    b_fused = b_fused.at[:, D_pad:D_pad + D_out].set(
        b_var.reshape(1, D_out).astype(jnp.float32))

    # Batch tiling: TB rows per grid step (multiple of 8).
    TB = min(block_b, _round_up(B, 8))
    B_pad = _round_up(B, TB)
    num_tiles = B_pad // TB

    h_p = jnp.zeros((B_pad, D_in), jnp.float32).at[:B].set(h.astype(jnp.float32))
    eps_p = jnp.zeros((B_pad, D_pad), jnp.float32).at[:B, :D_out].set(
        eps.astype(jnp.float32))

    kernel = functools.partial(
        _sampling_kernel,
        sample_rate=float(sample_rate),
        batch_size=B,
        block_b=TB,
        d_pad=D_pad,
    )

    z_p, kl_part = pl.pallas_call(
        kernel,
        grid=(num_tiles,),
        in_specs=[
            pl.BlockSpec((TB, D_in), lambda i: (i, 0)),          # h tile
            pl.BlockSpec((D_in, 2 * D_pad), lambda i: (0, 0)),   # resident weights
            pl.BlockSpec((1, 2 * D_pad), lambda i: (0, 0)),      # resident bias
            pl.BlockSpec((TB, D_pad), lambda i: (i, 0)),         # eps tile
        ],
        out_specs=(
            pl.BlockSpec((TB, D_pad), lambda i: (i, 0)),         # z tile (lane-dense)
            pl.BlockSpec((1, 1), lambda i: (i, 0),
                         memory_space=pltpu.MemorySpace.SMEM),   # per-tile KL partial
        ),
        out_shape=(
            jax.ShapeDtypeStruct((B_pad, D_pad), jnp.float32),
            jax.ShapeDtypeStruct((num_tiles, 1), jnp.float32),
        ),
        compiler_params=pltpu.CompilerParams(
            dimension_semantics=("parallel",)),
    )(h_p, w_fused, b_fused, eps_p)

    z_vecs = z_p[:B, :D_out]
    kl_loss = jnp.sum(kl_part) / jnp.float32(B)
    return z_vecs, kl_loss


def _reference(h, w_mean, b_mean, w_var, b_var, eps, sample_rate=1.0):
    z_mean = h @ w_mean + b_mean
    z_log_var = -jnp.abs(h @ w_var + b_var)
    B = h.shape[0]
    kl = -0.5 * jnp.sum(1.0 + z_log_var - z_mean * z_mean - jnp.exp(z_log_var)) / B
    z = z_mean + jnp.exp(z_log_var / 2.0) * eps * sample_rate
    return z, kl


if __name__ == "__main__":
    key = jax.random.PRNGKey(0)
    k_h, k_wm, k_bm, k_wv, k_bv, k_eps = jax.random.split(key, 6)

    batch = 2
    input_size = 32
    output_size = 16

    # Deterministic "nn.Linear"-style init: U(-1/sqrt(fan_in), 1/sqrt(fan_in))
    bound = 1.0 / jnp.sqrt(jnp.float32(input_size))
    h = jax.random.normal(k_h, (batch, input_size), dtype=jnp.float32)
    w_mean = jax.random.uniform(k_wm, (input_size, output_size),
                                minval=-bound, maxval=bound, dtype=jnp.float32)
    b_mean = jax.random.uniform(k_bm, (1, output_size),
                                minval=-bound, maxval=bound, dtype=jnp.float32)
    w_var = jax.random.uniform(k_wv, (input_size, output_size),
                               minval=-bound, maxval=bound, dtype=jnp.float32)
    b_var = jax.random.uniform(k_bv, (1, output_size),
                               minval=-bound, maxval=bound, dtype=jnp.float32)
    # epsilon ~ N(0,1), same shape as z_mean (torch.randn_like equivalent)
    eps = jax.random.normal(k_eps, (batch, output_size), dtype=jnp.float32)

    z_vecs, kl_loss = sampling_forward(h, w_mean, b_mean, w_var, b_var, eps,
                                       sample_rate=1.0)
    jax.block_until_ready((z_vecs, kl_loss))

    z_ref, kl_ref = _reference(h, w_mean, b_mean, w_var, b_var, eps, 1.0)
    assert jnp.allclose(z_vecs, z_ref, atol=1e-5, rtol=1e-5)
    assert jnp.allclose(kl_loss, kl_ref, atol=1e-5, rtol=1e-5)

    print("KERNEL_OK")
</pallas_src>

<mosaic_0001>
module attributes {stable_mosaic.version = 11 : i64} {
  func.func @_sampling_kernel(%arg0: i32, %arg1: memref<8x32xf32, #tpu.memory_space<vmem>>, %arg2: memref<32x256xf32, #tpu.memory_space<vmem>>, %arg3: memref<1x256xf32, #tpu.memory_space<vmem>>, %arg4: memref<8x128xf32, #tpu.memory_space<vmem>>, %arg5: memref<8x128xf32, #tpu.memory_space<vmem>>, %arg6: memref<1x1xf32, #tpu.memory_space<smem>>) attributes {dimension_semantics = [#tpu.dimension_semantics<parallel>], iteration_bounds = array<i64: 1>, scalar_prefetch = 0 : i64, scratch_operands = 0 : i64, tpu.core_type = #tpu.core_type<tc>, window_params = [{transform_indices = @transform_0, window_bounds = array<i64: 8, 32>}, {pipeline_mode = #tpu.pipeline_mode<synchronous>, transform_indices = @transform_1, window_bounds = array<i64: 32, 256>}, {pipeline_mode = #tpu.pipeline_mode<synchronous>, transform_indices = @transform_2, window_bounds = array<i64: 1, 256>}, {transform_indices = @transform_3, window_bounds = array<i64: 8, 128>}, {transform_indices = @transform_4, window_bounds = array<i64: 8, 128>}, {transform_indices = @transform_5, window_bounds = array<i64: 1, 1>}]} {
    %c0 = arith.constant 0 : index
    %c0_0 = arith.constant 0 : index
    %0 = vector.load %arg1[%c0, %c0_0] : memref<8x32xf32, #tpu.memory_space<vmem>>, vector<8x32xf32>
    %c0_1 = arith.constant 0 : index
    %c0_2 = arith.constant 0 : index
    %1 = vector.load %arg2[%c0_1, %c0_2] : memref<32x256xf32, #tpu.memory_space<vmem>>, vector<32x256xf32>
    %cst = arith.constant dense<0.000000e+00> : vector<8x256xf32>
    %2 = tpu.matmul %0, %1, %cst {dimension_numbers = #tpu.dot_dimension_numbers<[1], [0], [0], [1], [0, 0, 1, 1], [], []>} : vector<8x32xf32>, vector<32x256xf32>, vector<8x256xf32> -> vector<8x256xf32>
    %c0_3 = arith.constant 0 : index
    %c0_4 = arith.constant 0 : index
    %3 = vector.load %arg3[%c0_3, %c0_4] : memref<1x256xf32, #tpu.memory_space<vmem>>, vector<1x256xf32>
    %4 = vector.broadcast %3 : vector<1x256xf32> to vector<8x256xf32>
    %5 = arith.addf %2, %4 : vector<8x256xf32>
    %6 = vector.extract_strided_slice %5 {offsets = [0, 0], sizes = [8, 128], strides = [1, 1]} : vector<8x256xf32> to vector<8x128xf32>
    %7 = vector.extract_strided_slice %5 {offsets = [0, 128], sizes = [8, 128], strides = [1, 1]} : vector<8x256xf32> to vector<8x128xf32>
    %8 = math.absf %7 : vector<8x128xf32>
    %cst_5 = arith.constant 0.000000e+00 : f32
    %9 = vector.broadcast %cst_5 : f32 to vector<8x128xf32>
    %10 = arith.subf %9, %8 : vector<8x128xf32>
    %cst_6 = arith.constant 5.000000e-01 : f32
    %11 = vector.broadcast %cst_6 : f32 to vector<8x128xf32>
    %12 = arith.mulf %11, %10 : vector<8x128xf32>
    %13 = math.exp %12 : vector<8x128xf32>
    %c8_i32 = arith.constant 8 : i32
    %14 = arith.muli %arg0, %c8_i32 : i32
    %15 = tpu.iota {dimensions = array<i32: 0>} : vector<8x128xi32>
    %16 = vector.broadcast %14 : i32 to vector<8x128xi32>
    %17 = arith.addi %16, %15 : vector<8x128xi32>
    %c2_i32 = arith.constant 2 : i32
    %18 = vector.broadcast %c2_i32 : i32 to vector<8x128xi32>
    %19 = arith.cmpi slt, %17, %18 : vector<8x128xi32>
    %cst_7 = arith.constant 1.000000e+00 : f32
    %20 = vector.broadcast %cst_7 : f32 to vector<8x128xf32>
    %21 = arith.addf %20, %10 : vector<8x128xf32>
    %22 = arith.mulf %6, %6 : vector<8x128xf32>
    %23 = arith.subf %21, %22 : vector<8x128xf32>
    %24 = arith.mulf %13, %13 : vector<8x128xf32>
    %25 = arith.subf %23, %24 : vector<8x128xf32>
    %cst_8 = arith.constant 0.000000e+00 : f32
    %26 = vector.broadcast %cst_8 : f32 to vector<8x128xf32>
    %27 = arith.select %19, %25, %26 : vector<8x128xi1>, vector<8x128xf32>
    %28 = vector.shape_cast %27 : vector<8x128xf32> to vector<1x8x128xf32>
    %cst_9 = arith.constant dense<0.000000e+00> : vector<1xf32>
    %29 = vector.multi_reduction <add>, %28, %cst_9 [1, 2] : vector<1x8x128xf32> to vector<1xf32>
    %30 = vector.shape_cast %29 : vector<1xf32> to vector<1x1x1xf32>
    %31 = vector.extract %30[0, 0, 0] : f32 from vector<1x1x1xf32>
    %cst_10 = arith.constant -5.000000e-01 : f32
    %32 = arith.mulf %cst_10, %31 : f32
    %c0_11 = arith.constant 0 : index
    %c0_12 = arith.constant 0 : index
    %33 = memref.load %arg6[%c0_11, %c0_12] : memref<1x1xf32, #tpu.memory_space<smem>>
    memref.store %32, %arg6[%c0_11, %c0_12] : memref<1x1xf32, #tpu.memory_space<smem>>
    %c0_13 = arith.constant 0 : index
    %c0_14 = arith.constant 0 : index
    %34 = vector.load %arg4[%c0_13, %c0_14] : memref<8x128xf32, #tpu.memory_space<vmem>>, vector<8x128xf32>
    %35 = arith.mulf %13, %34 : vector<8x128xf32>
    %cst_15 = arith.constant 1.000000e+00 : f32
    %36 = vector.broadcast %cst_15 : f32 to vector<8x128xf32>
    %37 = arith.mulf %35, %36 : vector<8x128xf32>
    %38 = arith.addf %6, %37 : vector<8x128xf32>
    %c0_16 = arith.constant 0 : index
    %c0_17 = arith.constant 0 : index
    %39 = vector.load %arg5[%c0_16, %c0_17] : memref<8x128xf32, #tpu.memory_space<vmem>>, vector<8x128xf32>
    tpu.vector_store %arg5[%c0_16, %c0_17], %38 {strides = array<i32>} : memref<8x128xf32, #tpu.memory_space<vmem>>, vector<8x128xf32>,
    return
  }
  func.func @transform_0(%arg0: i32) -> (i32, i32) {
    %c0_i32 = arith.constant 0 : i32
    %c0_i32_0 = arith.constant 0 : i32
    return %arg0, %c0_i32 : i32, i32
  }
  func.func @transform_1(%arg0: i32) -> (i32, i32) {
    %c0_i32 = arith.constant 0 : i32
    %c0_i32_0 = arith.constant 0 : i32
    %c0_i32_1 = arith.constant 0 : i32
    return %c0_i32, %c0_i32_0 : i32, i32
  }
  func.func @transform_2(%arg0: i32) -> (i32, i32) {
    %c0_i32 = arith.constant 0 : i32
    %c0_i32_0 = arith.constant 0 : i32
    %c0_i32_1 = arith.constant 0 : i32
    return %c0_i32, %c0_i32_0 : i32, i32
  }
  func.func @transform_3(%arg0: i32) -> (i32, i32) {
    %c0_i32 = arith.constant 0 : i32
    %c0_i32_0 = arith.constant 0 : i32
    return %arg0, %c0_i32 : i32, i32
  }
  func.func @transform_4(%arg0: i32) -> (i32, i32) {
    %c0_i32 = arith.constant 0 : i32
    %c0_i32_0 = arith.constant 0 : i32
    return %arg0, %c0_i32 : i32, i32
  }
  func.func @transform_5(%arg0: i32) -> (i32, i32) {
    %c0_i32 = arith.constant 0 : i32
    %c0_i32_0 = arith.constant 0 : i32
    return %arg0, %c0_i32 : i32, i32
  }
}

</mosaic_0001>

<bundles_post_ra>
// kernel: tpu_custom_call.1
= control target key start
LH: loop header
LB: loop body
LE: loop exit
PB: predicated region body
PF: predicated region fallthrough
CT: control target
= control target key end

     0   :  { %11 = vsyncpa [#allocation3], 0  ;;  %s407_s0 = inlined_call_operand.hbm [shape: f32[8,32], index: 0, kind: input, shape index: {}]   ;;  %s408_s1 = inlined_call_operand.hbm [shape: f32[32,256], index: 1, kind: input, shape index: {}]   ;;  %s409_s2 = inlined_call_operand.vmem [shape: f32[1,256], index: 2, kind: input, shape index: {}]   ;;  %s410_s3 = inlined_call_operand.vmem [shape: f32[8,128], index: 3, kind: input, shape index: {}]   ;;  %s411_s4 = inlined_call_operand.hbm [shape: f32[8,128], index: 4, kind: output, shape index: {0}]   ;;  %s412_s5 = inlined_call_operand.hbm [shape: f32[1,1], index: 5, kind: output, shape index: {1}]  }
   0x1   :  { %12 = vsyncpa [#allocation7], 0 }
   0x2   :  { %13 = vsyncpa [#allocation4], 0 }
   0x3   :  { %14 = vsyncpa [#allocation5], 0  ;;  %s309_s18 = smov [#allocation2]   ;;  %s310_s20 = smov [#allocation6]  }
   0x4   :  { %s21_s19 = sshll.u32 %s309_s18, 4  ;;  %s30_s21 = sshll.u32 %s310_s20, 4  ;;  %s22_s19 = int_to_ptr.vmem [resolvable:$true] %s21_s19  ;;  %s346_s21 = int_to_ptr.vmem [resolvable:$true] %s30_s21 }
   0x5   :  { %s225_s24 = scalar_lea.hbm %s407_s0, 128 }
   0x6   :  { %p226_p0 = scmp.ne.s32.totalorder %s407_s0, %s225_s24  ;;  %p229_p1 = scmp.lt.u32.totalorder %s225_s24, %s407_s0 }
   0x8   :  { %p231_p2 = pnand %p229_p1, %p226_p0 }
   0xa   :  { %234 = shalt.err (!%p231_p2)
}
   0xb   :  { %s235_s29 = scalar_lea.vmem %s22_s19, 128  ;;  %p240_p4 = scmp.lt.s32.totalorder %s22_s19, %s22_s19 }
   0xc   :  { %p236_p3 = scmp.ne.s32.totalorder %s22_s19, %s235_s29  ;;  %p241_p5 = scmp.lt.s32.totalorder %s235_s29, %s235_s29 }
   0xe   :  { %p242_p6 = por %p241_p5, %p240_p4 }
  0x10   :  { %p243_p7 = pnand %p242_p6, %p236_p3 }
  0x12   :  { %246 = shalt.err (!%p243_p7)
}
  0x13   :  { %24 = dma.hbm_to_vmem [thread:$0]  %s407_s0, 128, %s22_s19, [#allocation3]  }
  0x14   :  { %s247_s9 = scalar_lea.hbm %s408_s1, 1024 }
  0x15   :  { %p248_p8 = scmp.ne.s32.totalorder %s408_s1, %s247_s9  ;;  %p251_p9 = scmp.lt.u32.totalorder %s247_s9, %s408_s1 }
  0x17   :  { %p253_p10 = pnand %p251_p9, %p248_p8 }
  0x19   :  { %256 = shalt.err (!%p253_p10)
}
  0x1a   :  { %s257_s14 = scalar_lea.vmem %s346_s21, 1024  ;;  %p262_p12 = scmp.lt.s32.totalorder %s346_s21, %s346_s21 }
  0x1b   :  { %p258_p11 = scmp.ne.s32.totalorder %s346_s21, %s257_s14  ;;  %p263_p13 = scmp.lt.s32.totalorder %s257_s14, %s257_s14 }
  0x1d   :  { %p264_p0 = por %p263_p13, %p262_p12 }
  0x1f   :  { %p265_p1 = pnand %p264_p0, %p258_p11 }
  0x21   :  { %268 = shalt.err (!%p265_p1)
}
  0x22   :  { %s311_s0 = smov 256   ;;  %s312_s15 = smov 16  }
  0x23   :  { %36 = dma.hbm_to_vmem [thread:$0]  %s408_s1, 1024, %s346_s21, [#allocation7], %s311_s0, %s311_s0, %s312_s15  }
  0x24   :  { %301 = dma.done.wait [#allocation3], 128  }
  0x25   :  { %302 = vsyncadd [#allocation3], 4294967168 }
  0x26   :  { %303 = dma.done.wait [#allocation7], 1024  }
  0x27   :  { %304 = vsyncadd [#allocation7], 4294966272  ;;  %v313_v0 = vmov 0.0   ;;  %v49_v1 = vld [vmem:[#allocation6 + $0x8] sm:$0xff]  ;;  %v51_v2 = vld [vmem:[#allocation6 + $0x18] sm:$0xff]  ;;  %vm68_vm0 = vcmask 261120   ;;  %v58_v14 = vlaneseq }
  0x28   :  { %136 = vmatprep.mubr.f32.mxu0 %v313_v0  ;;  %v48_v3 = vld [vmem:[#allocation6] sm:$0xff]  ;;  %v206_v4 = vpack.c.bf16 %v51_v2, %v49_v1  ;;  %v50_v5 = vld [vmem:[#allocation6 + $0x10] sm:$0xff]  ;;  %v53_v6 = vld [vmem:[#allocation6 + $0x28] sm:$0xff] }
  0x29   :  { %v55_v7 = vld [vmem:[#allocation6 + $0x38] sm:$0xff]  ;;  %v208_v8 = vpack.c.bf16 %v50_v5, %v48_v3  ;;  %v52_v10 = vld [vmem:[#allocation6 + $0x20] sm:$0xff]  ;;  %v54_v11 = vld [vmem:[#allocation6 + $0x30] sm:$0xff]  ;;  %v59_v15 = vshrl.u32 %v58_v14, 7 }
  0x2a   :  { %v210_v9 = vpack.c.bf16 %v55_v7, %v53_v6  ;;  %207 = vmatprep.subr.bf16.mxu0 %v206_v4  ;;  %v212_v12 = vpack.c.bf16 %v54_v11, %v52_v10  ;;  %v47_v13 = vld [vmem:[#allocation2] sm:$0xff] }
  0x2b   :  { %209 = vmatpush1.bf16.msra.mxu0 %v208_v8  ;;  %v64_v16 = vsub.s32 1, %v59_v15  ;;  %v56_v17 = vld [vmem:[%s409_s2] sm:$0x3]  ;;  %v60_v18 = vsub.s32 0, %v59_v15  ;;  %vm153_vm1 = vcmp.lt.s32.totalorder %v59_v15, 2  ;;  %s314_s2 = smov [#allocation8]  }
  0x2c   :  { %211 = vmatprep.subr.bf16.mxu0 %v210_v9  ;;  %v172_v32 = vld [vmem:[%s410_s3] sm:$0xff]  ;;  %s182_s21 = sshll.u32 %s314_s2, 4  ;;  %s183_s21 = int_to_ptr.vmem [resolvable:$true] %s182_s21 }
  0x2d   :  { %v65_v19 = vrot.slane %v56_v17, %v64_v16  ;;  %v61_v20 = vrot.slane %v56_v17, %v60_v18  ;;  %s269_s22 = scalar_lea.vmem %s183_s21, 128  ;;  %p274_p3 = scmp.lt.s32.totalorder %s183_s21, %s183_s21 }
  0x2e   :  { %p270_p2 = scmp.ne.s32.totalorder %s183_s21, %s269_s22  ;;  %p275_p4 = scmp.lt.s32.totalorder %s269_s22, %s269_s22 }
  0x2f   :  { %213 = vmatpush1.bf16.msra.mxu0 %v212_v12 }
  0x30   :  { %p276_p5 = por %p275_p4, %p274_p3 }
  0x32   :  { %205 = vmatmul.mubr.msk.f32.vlgmr.msra.gmra.mrb[0].mxu0 %vm68_vm0, %v47_v13  ;;  %p277_p6 = pnand %p276_p5, %p270_p2 }
 0x105   :  { %v138_v21 = vpop.f32.mrb[0].mxu0 }
 0x106   :  { %v140_v22 = vpop.f32.mrb[1].mxu0  ;;  %v139_v24 = vadd.f32 %v138_v21, %v61_v20 }
 0x107   :  { %v141_v23 = vadd.f32 %v140_v22, %v65_v19 }
 0x108   :  { %v155_v27 = vmul.f32 %v139_v24, %v139_v24 }
 0x109   :  { %v143_v25 = vand.u32 2147483647, %v141_v23 }
 0x10b   :  { %v144_v26 = vsub.f32 0.0, %v143_v25 }
 0x10d   :  { %v145_v28 = vmul.f32 0.5, %v144_v26  ;;  %v154_v29 = vadd.f32 1.0, %v144_v26 }
 0x10f   :  { %v146_v30 = vmul.f32 1.442695, %v145_v28  ;;  %v156_v31 = vsub.f32 %v154_v29, %v155_v27 }
 0x111   :  { %223 = vpow2.f32 %v146_v30 }
 0x11b   :  { %v224_v33 = vpop.eup %223 }
 0x11c   :  { %v157_v34 = vmul.f32 %v224_v33, %v224_v33  ;;  %v173_v35 = vmul.f32 %v224_v33, %v172_v32 }
 0x11e   :  { %v158_v36 = vsub.f32 %v156_v31, %v157_v34  ;;  %v174_v37 = vadd.f32 %v173_v35, %v139_v24 }
 0x120   :  { %v159_v38 = vsel %vm153_vm1, %v158_v36, 0.0  ;;  %175 = vst [vmem:[#allocation8] sm:$0xff] %v174_v37 }
 0x121   :  { %160 = vadd.xlane.f32.xlu0 %v159_v38 }
 0x122   :  { %280 = shalt.err (!%p277_p6)
}
 0x123   :  { %s281_s24 = scalar_lea.hbm %s411_s4, 128 }
 0x124   :  { %p282_p7 = scmp.ne.s32.totalorder %s411_s4, %s281_s24  ;;  %p285_p8 = scmp.lt.u32.totalorder %s281_s24, %s411_s4 }
 0x126   :  { %p287_p9 = pnand %p285_p8, %p282_p7 }
 0x128   :  { %290 = shalt.err (!%p287_p9)
}
 0x129   :  { %185 = dma.vmem_to_hbm [thread:$0]  %s183_s21, 128, %s411_s4, [#allocation4]  }
 0x12a   :  { %s291_s10 = scalar_lea.hbm %s412_s5, 16 }
 0x12b   :  { %p292_p10 = scmp.ne.s32.totalorder %s412_s5, %s291_s10  ;;  %p295_p11 = scmp.lt.u32.totalorder %s291_s10, %s412_s5 }
 0x12d   :  { %p297_p12 = pnand %p295_p11, %p292_p10 }
 0x1ae   :  { %v161_v39 = vpop.xlane.xlu0 %160 }
 0x1af   :  { %v162_v40 = vrot.slane %v161_v39, 4 }
 0x1b1   :  { %v163_v41 = vadd.f32 %v162_v40, %v161_v39 }
 0x1b3   :  { %v164_v42 = vrot.slane %v163_v41, 2 }
 0x1b5   :  { %v165_v43 = vadd.f32 %v164_v42, %v163_v41 }
 0x1b7   :  { %v166_v44 = vrot.slane %v165_v43, 1 }
 0x1b9   :  { %v167_v45 = vadd.f32 %v166_v44, %v165_v43 }
 0x1bb   :  { %214 = vpush %v167_v45 }
 0x1ec   :  { %s215_s6 = spop %214 }
 0x1ed   :  { %s169_s7 = smul.f32 -0.5, %s215_s6 }
 0x1ef   :  { %171 = sst [smem:[#allocation9]] %s169_s7 }
 0x1f0   :  { %300 = shalt.err (!%p297_p12)
}
 0x1f1   :  { %s315_s14 = smov [#allocation9]  }
 0x1f2   :  { %193 = dma.smem_to_hbm %s315_s14, 16, %s412_s5, [#allocation5]  }
 0x1f3   :  { %305 = dma.done.wait [#allocation4], 128  }
 0x1f4   :  { %306 = vsyncadd [#allocation4], 4294967168 }
 0x1f5   :  { %307 = dma.done.wait [#allocation5], 16  }
 0x1f6   :  { %308 = vsyncadd [#allocation5], 4294967280 }
 0x1f7   :  { %200 = sfence }
 0x1f8   :  { %201 = vsyncpa [#allocation3], 1 }
 0x1f9   :  { %202 = vsyncpa [#allocation7], 1 }
 0x1fa   :  { %203 = vsyncpa [#allocation4], 1 }
 0x1fb   :  { %204 = vsyncpa [#allocation5], 1 }

</bundles_post_ra>
